<compile_context>
chip_gen: v6e
topology: v6e:2x2x1
jax: 0.10.0
libtpu: 0.0.40
codegen_flags: <defaults>
</compile_context>

<pallas_src>
import functools

import numpy as np

import jax
import jax.numpy as jnp
from jax.experimental import pallas as pl
from jax.experimental.pallas import tpu as pltpu

_LANES = 128
_SUBLANES = 8
_MAX_TL = 2048   # lane-tile cap: keeps (TB, TL) blocks inside the v7x 64 MiB VMEM budget
_MAX_TB = 256    # row-tile cap (same budget)


def _cdiv(a, b):
    return -(-a // b)


def _round_up(a, b):
    return _cdiv(a, b) * b


def _bce_kernel(inv_ref, p_ref, y_ref, out_ref):
    """Grid step (i, j): row-block i, sequence-chunk j -> accumulate loss sum.

    inv_ref : (TB, 1)  f32   1/len per row (0 for padded rows)
    p_ref   : (TB, TL) f32   probabilities, padded with 1.0
    y_ref   : (TB, TL) bf16  labels, padded with 1.0 (pads contribute exactly 0)
    out_ref : (1, 128) f32   lane-dense output block, resident across the
                             j ("arbitrary") axis -> used as the accumulator.
    """
    j = pl.program_id(1)

    @pl.when(j == 0)
    def _():
        out_ref[...] = jnp.zeros_like(out_ref)

    p = p_ref[...]
    y = y_ref[...].astype(jnp.float32)

    # F.binary_cross_entropy clamps each log term at -100 (avoids 0*inf NaNs).
    log_p = jnp.maximum(jnp.log(p), -100.0)
    log_1mp = jnp.maximum(jnp.log(1.0 - p), -100.0)
    elem = -(y * log_p + (1.0 - y) * log_1mp)
    # Pad elements: p = y = 1  ->  y*log(1) = 0 and (1-y)*(-100) = 0.

    row_sums = jnp.sum(elem, axis=-1, keepdims=True)          # (TB, 1)
    partial = jnp.sum(row_sums * inv_ref[...])                # sum of row means (this chunk)

    lane = jax.lax.broadcasted_iota(jnp.int32, out_ref.shape, 1)
    out_ref[...] += jnp.where(lane == 0, partial, jnp.float32(0.0))


@functools.partial(jax.jit, static_argnames=("tb", "tl"))
def _bce_row_loss_sum(inv_n, probs_padded, labels_padded, *, tb, tl):
    """Sum over all (real) rows of the per-row BCE mean."""
    Bpad, Lpad = probs_padded.shape
    G = Bpad // tb
    J = Lpad // tl

    # Double-buffered footprint: f32 probs + bf16 labels + small f32 inv column.
    vmem_bytes = 2 * ((4 + 2) * tb * tl + 4 * tb * _LANES) + (1 << 20)
    vmem_limit = int(min(64 << 20, max(8 << 20, 2 * vmem_bytes)))

    out = pl.pallas_call(
        _bce_kernel,
        out_shape=jax.ShapeDtypeStruct((1, G * _LANES), jnp.float32),
        grid=(G, J),
        in_specs=[
            pl.BlockSpec((tb, 1), lambda i, j: (i, 0)),     # 1/len per row
            pl.BlockSpec((tb, tl), lambda i, j: (i, j)),    # probs (f32)
            pl.BlockSpec((tb, tl), lambda i, j: (i, j)),    # labels (bf16)
        ],
        # Same output block across j -> VMEM-resident accumulator.
        out_specs=pl.BlockSpec((1, _LANES), lambda i, j: (0, i)),
        compiler_params=pltpu.CompilerParams(
            dimension_semantics=("parallel", "arbitrary"),
            vmem_limit_bytes=vmem_limit,
        ),
    )(inv_n, probs_padded, labels_padded)
    # Padded lanes/blocks are zero, so a plain sum gives the row-loss total.
    return jnp.sum(out)


def _choose_tiles(B, max_len):
    """Pick (Bpad, Lpad, TB, TL) for the padded layout."""
    Lpad = _round_up(max(max_len, 1), _LANES)
    if Lpad > _MAX_TL:
        TL = _MAX_TL
        Lpad = _round_up(Lpad, TL)
    else:
        TL = Lpad

    Bpad8 = _round_up(max(B, 1), _SUBLANES)
    # Big enough that one step moves ~2 MiB of f32 probs (amortizes the
    # ~0.35us/step overhead) ...
    target_rows = max(_SUBLANES, (2 << 20) // (4 * TL))
    TB = min(_round_up(target_rows, _SUBLANES), _MAX_TB, Bpad8)
    # ... but keep >= 4 row blocks when the batch allows, so the 'parallel'
    # row axis can be sharded across v7x's two TensorCores and the pipeline
    # always has blocks to prefetch.
    if Bpad8 >= 4 * _SUBLANES:
        TB = min(TB, _round_up(_cdiv(Bpad8, 4), _SUBLANES))
    TB = max(TB, _SUBLANES)
    Bpad = _round_up(Bpad8, TB)
    return Bpad, Lpad, TB, TL


def _pack(labels_list, probs_list):
    """One-shot host-side packing of the ragged list into padded slabs.

    Probs and labels are padded with 1.0 so padded elements contribute exactly
    zero BCE (y*log(1)=0 and (1-y)=0 kills the clamped log(0) term) -> no
    in-kernel mask is needed.
    """
    # TODO(synk): for device-resident inputs or highly ragged lengths, pack on
    # device (or into one dense concatenated slab + scalar-prefetched per-row
    # offsets) instead of per-call host padding; the padded HBM traffic and the
    # H2D copy dominate end-to-end for large inputs.
    B = len(probs_list)
    lens = [int(np.asarray(p).shape[0]) for p in probs_list]
    Bpad, Lpad, TB, TL = _choose_tiles(B, max(lens))

    probs = np.ones((Bpad, Lpad), dtype=np.float32)
    labels = np.ones((Bpad, Lpad), dtype=np.float32)
    inv_n = np.zeros((Bpad, 1), dtype=np.float32)
    for b, (p, lab, n) in enumerate(zip(probs_list, labels_list, lens)):
        probs[b, :n] = np.asarray(p, dtype=np.float32)
        labels[b, :n] = np.asarray(lab, dtype=np.float32)[0, :n]
        inv_n[b, 0] = 1.0 / max(n, 1)

    # Labels stored bf16 (exact for hard 0/1 targets) to cut HBM traffic;
    # probs stay f32 so log(p) near 0/1 keeps full precision.
    return (jnp.asarray(inv_n),
            jnp.asarray(probs),
            jnp.asarray(labels, dtype=jnp.bfloat16),
            TB, TL)


def custom_bce(labels_list, probs_list):
    """Mirrors CustomBCE.forward(labels, probs) from the PyTorch module.

    labels_list: list of arrays of shape (1, L_full)
    probs_list:  list of 1-D arrays of probabilities, len_b <= L_full
    """
    B = len(probs_list)
    if B == 0:
        return jnp.float32(0.0)
    inv_n, probs_padded, labels_padded, TB, TL = _pack(labels_list, probs_list)
    total = _bce_row_loss_sum(inv_n, probs_padded, labels_padded, tb=TB, tl=TL)
    return total / jnp.float32(B)


def _reference(labels_list, probs_list):
    total = 0.0
    for prob, lab in zip(probs_list, labels_list):
        y = lab[0, : prob.shape[0]].astype(jnp.float32)
        p = prob.astype(jnp.float32)
        lp = jnp.maximum(jnp.log(p), -100.0)
        l1 = jnp.maximum(jnp.log(1.0 - p), -100.0)
        total = total + jnp.mean(-(y * lp + (1.0 - y) * l1))
    return total / len(probs_list)


if __name__ == "__main__":
    key = jax.random.PRNGKey(0)
    seq_lens = [8, 16, 12, 10]           # variable-length "summaries"
    L_full = 20                          # label_all second dim (>= each len)

    probs_list, labels_list = [], []
    for n in seq_lens:
        key, k1, k2 = jax.random.split(key, 3)
        probs_list.append(jax.nn.sigmoid(jax.random.normal(k1, (n,))))
        labels_list.append(
            jax.random.bernoulli(k2, 0.5, (1, L_full)).astype(jnp.float32))

    out = jax.block_until_ready(custom_bce(labels_list, probs_list))
    ref = jax.block_until_ready(_reference(labels_list, probs_list))
    assert jnp.allclose(out, ref, rtol=1e-5, atol=1e-5), (out, ref)
    print("KERNEL_OK")
</pallas_src>

<mosaic_0001>
module attributes {stable_mosaic.version = 11 : i64} {
  func.func @_bce_kernel(%arg0: i32, %arg1: i32, %arg2: memref<8x1xf32, #tpu.memory_space<vmem>>, %arg3: memref<8x128xf32, #tpu.memory_space<vmem>>, %arg4: memref<8x128xbf16, #tpu.memory_space<vmem>>, %arg5: memref<1x128xf32, #tpu.memory_space<vmem>>) attributes {dimension_semantics = [#tpu.dimension_semantics<parallel>, #tpu.dimension_semantics<arbitrary>], iteration_bounds = array<i64: 1, 1>, scalar_prefetch = 0 : i64, scratch_operands = 0 : i64, tpu.core_type = #tpu.core_type<tc>, window_params = [{transform_indices = @transform_0, window_bounds = array<i64: 8, 1>}, {transform_indices = @transform_1, window_bounds = array<i64: 8, 128>}, {transform_indices = @transform_2, window_bounds = array<i64: 8, 128>}, {transform_indices = @transform_3, window_bounds = array<i64: 1, 128>}]} {
    %c0_i32 = arith.constant 0 : i32
    %0 = arith.cmpi eq, %arg1, %c0_i32 : i32
    %1 = arith.extui %0 : i1 to i32
    %c0_i32_0 = arith.constant 0 : i32
    %2 = arith.cmpi ne, %1, %c0_i32_0 : i32
    scf.if %2 {
      %cst_18 = arith.constant 0.000000e+00 : f32
      %38 = vector.broadcast %cst_18 : f32 to vector<1x128xf32>
      %c0_19 = arith.constant 0 : index
      %c0_20 = arith.constant 0 : index
      %39 = vector.load %arg5[%c0_19, %c0_20] : memref<1x128xf32, #tpu.memory_space<vmem>>, vector<1x128xf32>
      tpu.vector_store %arg5[%c0_19, %c0_20], %38 {strides = array<i32>} : memref<1x128xf32, #tpu.memory_space<vmem>>, vector<1x128xf32>,
    } else {
    }
    %c0 = arith.constant 0 : index
    %c0_1 = arith.constant 0 : index
    %3 = vector.load %arg3[%c0, %c0_1] : memref<8x128xf32, #tpu.memory_space<vmem>>, vector<8x128xf32>
    %c0_2 = arith.constant 0 : index
    %c0_3 = arith.constant 0 : index
    %4 = vector.load %arg4[%c0_2, %c0_3] : memref<8x128xbf16, #tpu.memory_space<vmem>>, vector<8x128xbf16>
    %5 = arith.extf %4 : vector<8x128xbf16> to vector<8x128xf32>
    %6 = math.log %3 : vector<8x128xf32>
    %cst = arith.constant -1.000000e+02 : f32
    %7 = vector.broadcast %cst : f32 to vector<8x128xf32>
    %8 = arith.maximumf %6, %7 : vector<8x128xf32>
    %cst_4 = arith.constant 1.000000e+00 : f32
    %9 = vector.broadcast %cst_4 : f32 to vector<8x128xf32>
    %10 = arith.subf %9, %3 : vector<8x128xf32>
    %11 = math.log %10 : vector<8x128xf32>
    %cst_5 = arith.constant -1.000000e+02 : f32
    %12 = vector.broadcast %cst_5 : f32 to vector<8x128xf32>
    %13 = arith.maximumf %11, %12 : vector<8x128xf32>
    %14 = arith.mulf %5, %8 : vector<8x128xf32>
    %cst_6 = arith.constant 1.000000e+00 : f32
    %15 = vector.broadcast %cst_6 : f32 to vector<8x128xf32>
    %16 = arith.subf %15, %5 : vector<8x128xf32>
    %17 = arith.mulf %16, %13 : vector<8x128xf32>
    %18 = arith.addf %14, %17 : vector<8x128xf32>
    %cst_7 = arith.constant 0.000000e+00 : f32
    %19 = vector.broadcast %cst_7 : f32 to vector<8x128xf32>
    %20 = arith.subf %19, %18 : vector<8x128xf32>
    %cst_8 = arith.constant dense<0.000000e+00> : vector<8xf32>
    %21 = vector.multi_reduction <add>, %20, %cst_8 [1] : vector<8x128xf32> to vector<8xf32>
    %22 = vector.shape_cast %21 : vector<8xf32> to vector<8x1xf32>
    %c0_9 = arith.constant 0 : index
    %c0_10 = arith.constant 0 : index
    %23 = vector.load %arg2[%c0_9, %c0_10] : memref<8x1xf32, #tpu.memory_space<vmem>>, vector<8x1xf32>
    %24 = arith.mulf %22, %23 : vector<8x1xf32>
    %25 = vector.shape_cast %24 : vector<8x1xf32> to vector<1x8x1xf32>
    %cst_11 = arith.constant dense<0.000000e+00> : vector<1xf32>
    %26 = vector.multi_reduction <add>, %25, %cst_11 [1, 2] : vector<1x8x1xf32> to vector<1xf32>
    %27 = vector.shape_cast %26 : vector<1xf32> to vector<1x1x1xf32>
    %28 = vector.extract %27[0, 0, 0] : f32 from vector<1x1x1xf32>
    %29 = tpu.iota {dimensions = array<i32: 1>} : vector<1x128xi32>
    %c0_12 = arith.constant 0 : index
    %c0_13 = arith.constant 0 : index
    %30 = vector.load %arg5[%c0_12, %c0_13] : memref<1x128xf32, #tpu.memory_space<vmem>>, vector<1x128xf32>
    %c0_i32_14 = arith.constant 0 : i32
    %31 = vector.broadcast %c0_i32_14 : i32 to vector<1x128xi32>
    %32 = arith.cmpi eq, %29, %31 : vector<1x128xi32>
    %cst_15 = arith.constant 0.000000e+00 : f32
    %33 = vector.broadcast %28 : f32 to vector<1x128xf32>
    %34 = vector.broadcast %cst_15 : f32 to vector<1x128xf32>
    %35 = arith.select %32, %33, %34 : vector<1x128xi1>, vector<1x128xf32>
    %36 = arith.addf %30, %35 : vector<1x128xf32>
    %c0_16 = arith.constant 0 : index
    %c0_17 = arith.constant 0 : index
    %37 = vector.load %arg5[%c0_16, %c0_17] : memref<1x128xf32, #tpu.memory_space<vmem>>, vector<1x128xf32>
    tpu.vector_store %arg5[%c0_16, %c0_17], %36 {strides = array<i32>} : memref<1x128xf32, #tpu.memory_space<vmem>>, vector<1x128xf32>,
    return
  }
  func.func @transform_0(%arg0: i32, %arg1: i32) -> (i32, i32) {
    %c0_i32 = arith.constant 0 : i32
    %c0_i32_0 = arith.constant 0 : i32
    return %arg0, %c0_i32 : i32, i32
  }
  func.func @transform_1(%arg0: i32, %arg1: i32) -> (i32, i32) {
    %c0_i32 = arith.constant 0 : i32
    return %arg0, %arg1 : i32, i32
  }
  func.func @transform_2(%arg0: i32, %arg1: i32) -> (i32, i32) {
    %c0_i32 = arith.constant 0 : i32
    return %arg0, %arg1 : i32, i32
  }
  func.func @transform_3(%arg0: i32, %arg1: i32) -> (i32, i32) {
    %c0_i32 = arith.constant 0 : i32
    %c0_i32_0 = arith.constant 0 : i32
    return %c0_i32, %arg0 : i32, i32
  }
}

</mosaic_0001>

<bundles_post_ra>
// kernel: _bce_row_loss_sum.1
= control target key start
LH: loop header
LB: loop body
LE: loop exit
PB: predicated region body
PF: predicated region fallthrough
CT: control target
= control target key end

     0   :  { %vm38_vm0 = vcmask 7168   ;;  %v68_v19 = vmov 0.0   ;;  %v49_v27 = vlaneseq  ;;  %s107_s1 = inlined_call_operand.vmem [shape: f32[8,128], index: 1, kind: input, shape index: {}]   ;;  %s108_s2 = inlined_call_operand.vmem [shape: bf16[8,128], index: 2, kind: input, shape index: {}]   ;;  %s109_s0 = inlined_call_operand.vmem [shape: f32[8,1], index: 0, kind: input, shape index: {}]   ;;  %s110_s3 = inlined_call_operand.vmem [shape: f32[1,128], index: 3, kind: output, shape index: {}]  }
   0x1   :  { %v19_v0 = vld [vmem:[%s107_s1] sm:$0xff]  ;;  %18 = vst [vmem:[%s110_s3] sm:$0x1] %v68_v19 }
   0x2   :  { %64 = vlog2.f32 %v19_v0  ;;  %v25_v1 = vsub.f32 1.0, %v19_v0  ;;  %v20_v2 = vld [vmem:[%s108_s2] sm:$0xf]  ;;  %v50_v28 = vand.u32 127, %v49_v27 }
   0x3   :  { %v21_v3 = vunpack.c.l.bf16 %v20_v2  ;;  %v36_v15 = vld [vmem:[%s109_s0] sm:$0xff] }
   0x4   :  { %66 = vlog2.f32 %v25_v1  ;;  %vm52_vm1 = vcmp.eq.s32.totalorder %v50_v28, 0 }
   0x5   :  { %v30_v9 = vsub.f32 1.0, %v21_v3 }
   0x8   :  { %v51_v29 = vld [vmem:[%s110_s3] sm:$0x1] }
   0xf   :  { %v65_v4 = vpop.eup %64 }
  0x10   :  { %v23_v5 = vmul.f32 0.6931472, %v65_v4 }
  0x11   :  { %v67_v6 = vpop.eup %66 }
  0x12   :  { %v24_v7 = vmax.f32 %v23_v5, -100.0  ;;  %v27_v8 = vmul.f32 0.6931472, %v67_v6 }
  0x14   :  { %v28_v10 = vmax.f32 %v27_v8, -100.0  ;;  %v29_v11 = vmul.f32 %v24_v7, %v21_v3 }
  0x16   :  { %v31_v12 = vmul.f32 %v30_v9, %v28_v10 }
  0x18   :  { %v32_v13 = vadd.f32 %v31_v12, %v29_v11 }
  0x1a   :  { %v33_v14 = vsub.f32 0.0, %v32_v13 }
  0x1c   :  { %34 = vadd.xlane.f32.xlu0 %v33_v14 }
  0xa5   :  { %v35_v16 = vpop.xlane.xlu0 %34 }
  0xa6   :  { %v37_v17 = vmul.f32 %v36_v15, %v35_v16 }
  0xa8   :  { %v39_v18 = vsel %vm38_vm0, %v37_v17, 0.0 }
  0xa9   :  { %40 = vadd.xlane.f32.xlu0 %v39_v18 }
 0x132   :  { %v41_v20 = vpop.xlane.xlu0 %40 }
 0x133   :  { %v42_v21 = vrot.slane %v41_v20, 4 }
 0x135   :  { %v43_v22 = vadd.f32 %v42_v21, %v41_v20 }
 0x137   :  { %v44_v23 = vrot.slane %v43_v22, 2 }
 0x139   :  { %v45_v24 = vadd.f32 %v44_v23, %v43_v22 }
 0x13b   :  { %v46_v25 = vrot.slane %v45_v24, 1 }
 0x13d   :  { %v47_v26 = vadd.f32 %v46_v25, %v45_v24 }
 0x13f   :  { %61 = vpush %v47_v26 }
 0x170   :  { %s62_s0 = spop %61 }
 0x171   :  { %v53_v30 = vstv %s62_s0 }
 0x172   :  { %v54_v31 = vsel %vm52_vm1, %v53_v30, 0.0 }
 0x173   :  { %v55_v32 = vadd.f32 %v54_v31, %v51_v29 }
 0x175   :  { %56 = vst [vmem:[%s110_s3] sm:$0x1] %v55_v32 }

</bundles_post_ra>
